<compile_context>
chip_gen: v6e
topology: v6e:2x2x1
jax: 0.10.0
libtpu: 0.0.40
codegen_flags: <defaults>
</compile_context>

<pallas_src>
import functools

import jax
import jax.numpy as jnp
import numpy as np
from jax.experimental import pallas as pl
from jax.experimental.pallas import tpu as pltpu

PAD = 334   # hard-coded "while len(x) < 334" pad length == bat_size in the module
SUB = 16    # sublane padding granularity (bf16-friendly)


def _round_up(x, m):
    return (x + m - 1) // m * m


def _model_kernel(n_valid, e1_ref, rel_ref, e2_ref, ent_ref, relt_ref,
                  w1t_ref, b1_ref, w2_ref, b2_ref, wft_ref, bf_ref, out_ref):
    """Single-step grid; everything resident in VMEM.

    e1/rel/e2: (Bp, 1) int32      ent/relt: (Ne_p|Nr_p, D) bf16
    w1t: (3D, Wp) bf16            b1: (1, Wp) f32       w2: (1, Wp) f32
    b2:  (1, 1)  f32 in SMEM      wft: (Bp, Pp) bf16 (window of (336, Pp))
    bf:  (1, Pp) f32              out: (1, Pp) f32  (lane-dense row)
    """
    f32 = jnp.float32
    bf16 = jnp.bfloat16
    Bp = e1_ref.shape[0]
    D = ent_ref.shape[1]

    def gather_rows(idx_col_ref, tab_ref):
        # Fused embedding gather: one-hot(idx) @ table on the MXU (exact select).
        n = tab_ref.shape[0]
        lane = jax.lax.broadcasted_iota(jnp.int32, (Bp, n), 1)
        oh = (lane == idx_col_ref[...]).astype(bf16)           # (Bp, n)
        rows = jnp.dot(oh, tab_ref[...], preferred_element_type=f32)
        return rows.astype(bf16)                               # (Bp, D), exact

    e1v = gather_rows(e1_ref, ent_ref)                         # (Bp, D)
    rlv = gather_rows(rel_ref, relt_ref)                       # (Bp, D)
    e2v = gather_rows(e2_ref, ent_ref)                         # (Bp, D)

    # shallom: Linear(3D->W) -> ReLU -> Linear(W->1); concat replaced by the
    # pre-split W1 slices (static, tile-aligned slices of w1t).
    h = (jnp.dot(e1v, w1t_ref[0:D, :], preferred_element_type=f32)
         + jnp.dot(rlv, w1t_ref[D:2 * D, :], preferred_element_type=f32)
         + jnp.dot(e2v, w1t_ref[2 * D:3 * D, :], preferred_element_type=f32)
         + b1_ref[...])
    h = jnp.maximum(h, 0.0)                                    # (Bp, Wp) f32

    # per-triple score on the MXU, kept lane-dense: s = w2 @ h^T + b2 -> (1, Bp)
    s = jax.lax.dot_general(w2_ref[...], h,
                            dimension_numbers=(((1,), (1,)), ((), ())),
                            preferred_element_type=f32)
    s = s + b2_ref[0, 0]

    # zero-pad semantics of the module: triples >= n_valid contribute 0.
    # (mandatory: padded rows give s = relu(b1)@w2 + b2 != 0 otherwise)
    lane = jax.lax.broadcasted_iota(jnp.int32, (1, Bp), 1)
    s = jnp.where(lane < n_valid, s, 0.0)

    # fused shallom2 (Wf = w4 @ w3, bf = w4 @ b3 + b4 folded at prep time):
    # out = sigmoid(s @ Wf^T + bf)   -> (1, Pp), standard MXU matmul.
    out = jnp.dot(s.astype(bf16), wft_ref[...], preferred_element_type=f32)
    out_ref[...] = jax.nn.sigmoid(out + bf_ref[...])


def prepare_params(params):
    """One-time conversion of torch-layout params into kernel-ready layout."""
    f32, bf16 = jnp.float32, jnp.bfloat16
    D = params["ent_emb"].shape[1]
    Ne = params["ent_emb"].shape[0]
    Nr = params["rel_emb"].shape[0]
    W = params["w1"].shape[0]                  # shallom width = int(12.8 * D)
    Wp = _round_up(W, 128)                     # 409 -> 512
    Pp = _round_up(PAD, 128)                   # 334 -> 384
    Rp = _round_up(PAD, SUB)                   # 334 -> 336 (wft rows)

    ent = jnp.zeros((_round_up(Ne, SUB), D), f32).at[:Ne].set(params["ent_emb"]).astype(bf16)
    rel = jnp.zeros((_round_up(Nr, SUB), D), f32).at[:Nr].set(params["rel_emb"]).astype(bf16)

    w1t = jnp.zeros((3 * D, Wp), f32).at[:, :W].set(params["w1"].T).astype(bf16)
    b1 = jnp.zeros((1, Wp), f32).at[:, :W].set(params["b1"][None, :])
    w2 = jnp.zeros((1, Wp), f32).at[:, :W].set(params["w2"])          # torch (1, W)
    b2 = params["b2"].reshape(1, 1).astype(f32)

    # Fold shallom2's two Linears (no nonlinearity between them).
    wf = params["w4"] @ params["w3"]                                  # (PAD, PAD)
    bfv = params["w4"] @ params["b3"] + params["b4"]                  # (PAD,)
    wft = jnp.zeros((Rp, Pp), f32).at[:PAD, :PAD].set(wf.T).astype(bf16)
    bfp = jnp.zeros((1, Pp), f32).at[:, :PAD].set(bfv[None, :])

    return dict(ent_emb=ent, rel_emb=rel, w1t=w1t, b1=b1, w2=w2, b2=b2,
                wft=wft, bf=bfp)


def baseline_embeddings_only_forward(e1_idx, rel_idx, e2_idx, prepared):
    B = e1_idx.shape[0]
    assert 1 <= B <= PAD, "more than bat_size=334 triples: module would not pad"
    Bp = _round_up(B, SUB)
    Pp = prepared["bf"].shape[1]

    def pad_idx(idx):   # (B,) -> (Bp, 1) int32 column, padded with -1 (never matches)
        col = jnp.full((Bp, 1), -1, jnp.int32)
        return col.at[:B, 0].set(idx.astype(jnp.int32))

    e1c, rlc, e2c = pad_idx(e1_idx), pad_idx(rel_idx), pad_idx(e2_idx)

    def full(a):
        return pl.BlockSpec(a.shape, lambda i: (0,) * a.ndim)

    idx_spec = pl.BlockSpec((Bp, 1), lambda i: (0, 0))
    in_specs = [
        idx_spec, idx_spec, idx_spec,                              # e1, rel, e2
        full(prepared["ent_emb"]), full(prepared["rel_emb"]),      # tables
        full(prepared["w1t"]), full(prepared["b1"]), full(prepared["w2"]),
        pl.BlockSpec(memory_space=pltpu.MemorySpace.SMEM),         # b2 scalar
        pl.BlockSpec((Bp, Pp), lambda i: (0, 0)),                  # only Bp rows of Wf^T DMA'd
        full(prepared["bf"]),
    ]

    out = pl.pallas_call(
        functools.partial(_model_kernel, B),
        grid=(1,),
        out_shape=jax.ShapeDtypeStruct((1, Pp), jnp.float32),
        in_specs=in_specs,
        out_specs=pl.BlockSpec((1, Pp), lambda i: (0, 0)),
        compiler_params=pltpu.CompilerParams(dimension_semantics=("arbitrary",)),
    )(e1c, rlc, e2c,
      prepared["ent_emb"], prepared["rel_emb"],
      prepared["w1t"], prepared["b1"], prepared["w2"], prepared["b2"],
      prepared["wft"], prepared["bf"])
    return out[0, :PAD]


def init_params(key, embedding_dim, num_entities, num_relations):
    """Deterministic synthetic parameters matching the module's shapes (torch layout)."""
    D = embedding_dim
    W = int(12.8 * D)                 # shallom_width

    def linear(k, out_f, in_f):
        kw, kb = jax.random.split(k)
        bound = 1.0 / float(in_f) ** 0.5
        w = jax.random.uniform(kw, (out_f, in_f), jnp.float32, -bound, bound)
        b = jax.random.uniform(kb, (out_f,), jnp.float32, -bound, bound)
        return w, b

    ks = jax.random.split(key, 6)
    ent = jax.random.normal(ks[0], (num_entities, D), jnp.float32)
    rel = jax.random.normal(ks[1], (num_relations, D), jnp.float32)
    w1, b1 = linear(ks[2], W, 3 * D)      # shallom[0]:  Linear(3D, W)
    w2, b2 = linear(ks[3], 1, W)          # shallom[4]:  Linear(W, 1)
    w3, b3 = linear(ks[4], W, PAD)        # shallom2[0]: Linear(334, W)
    w4, b4 = linear(ks[5], PAD, W)        # shallom2[2]: Linear(W, 334)
    return dict(ent_emb=ent, rel_emb=rel,
                w1=w1, b1=b1, w2=w2, b2=b2,
                w3=w3, b3=b3, w4=w4, b4=b4)


def _reference_forward(e1_idx, rel_idx, e2_idx, params):
    """Pure-JAX f32 reference with the original (un-fused) two-stage structure."""
    x1 = jnp.concatenate(
        [params["ent_emb"][e1_idx], params["rel_emb"][rel_idx], params["ent_emb"][e2_idx]],
        axis=-1)
    h = jnp.maximum(x1 @ params["w1"].T + params["b1"], 0.0)
    s = h @ params["w2"].T + params["b2"]                       # (B, 1)
    x = jnp.zeros((PAD,), jnp.float32).at[: s.shape[0]].set(s[:, 0])
    h2 = params["w3"] @ x + params["b3"]
    return jax.nn.sigmoid(params["w4"] @ h2 + params["b4"])


if __name__ == "__main__":
    embedding_dim = 32
    num_entities = 50
    num_relations = 12
    batch = 8                          # number of triples fed to forward (<= 334)

    key = jax.random.PRNGKey(0)
    pkey, k1, k2, k3 = jax.random.split(key, 4)
    params = init_params(pkey, embedding_dim, num_entities, num_relations)
    prepared = prepare_params(params)   # one-time, kernel-ready layout

    e1_idx = jax.random.randint(k1, (batch,), 0, num_entities)
    rel_idx = jax.random.randint(k2, (batch,), 0, num_relations)
    e2_idx = jax.random.randint(k3, (batch,), 0, num_entities)

    fwd = jax.jit(baseline_embeddings_only_forward)
    out = jax.block_until_ready(fwd(e1_idx, rel_idx, e2_idx, prepared))
    assert out.shape == (PAD,) and out.dtype == jnp.float32

    ref = _reference_forward(e1_idx, rel_idx, e2_idx, params)
    np.testing.assert_allclose(np.asarray(out), np.asarray(ref), atol=2e-2, rtol=0)
    print("KERNEL_OK")
</pallas_src>

<mosaic_0001>
module attributes {stable_mosaic.version = 11 : i64} {
  func.func @_model_kernel(%arg0: i32, %arg1: memref<16x1xi32, #tpu.memory_space<vmem>>, %arg2: memref<16x1xi32, #tpu.memory_space<vmem>>, %arg3: memref<16x1xi32, #tpu.memory_space<vmem>>, %arg4: memref<64x32xbf16, #tpu.memory_space<vmem>>, %arg5: memref<16x32xbf16, #tpu.memory_space<vmem>>, %arg6: memref<96x512xbf16, #tpu.memory_space<vmem>>, %arg7: memref<1x512xf32, #tpu.memory_space<vmem>>, %arg8: memref<1x512xf32, #tpu.memory_space<vmem>>, %arg9: memref<1x1xf32, #tpu.memory_space<smem>>, %arg10: memref<16x384xbf16, #tpu.memory_space<vmem>>, %arg11: memref<1x384xf32, #tpu.memory_space<vmem>>, %arg12: memref<1x384xf32, #tpu.memory_space<vmem>>) attributes {dimension_semantics = [#tpu.dimension_semantics<arbitrary>], iteration_bounds = array<i64: 1>, scalar_prefetch = 0 : i64, scratch_operands = 0 : i64, tpu.core_type = #tpu.core_type<tc>, window_params = [{pipeline_mode = #tpu.pipeline_mode<synchronous>, transform_indices = @transform_0, window_bounds = array<i64: 16, 1>}, {pipeline_mode = #tpu.pipeline_mode<synchronous>, transform_indices = @transform_1, window_bounds = array<i64: 16, 1>}, {pipeline_mode = #tpu.pipeline_mode<synchronous>, transform_indices = @transform_2, window_bounds = array<i64: 16, 1>}, {pipeline_mode = #tpu.pipeline_mode<synchronous>, transform_indices = @transform_3, window_bounds = array<i64: 64, 32>}, {pipeline_mode = #tpu.pipeline_mode<synchronous>, transform_indices = @transform_4, window_bounds = array<i64: 16, 32>}, {pipeline_mode = #tpu.pipeline_mode<synchronous>, transform_indices = @transform_5, window_bounds = array<i64: 96, 512>}, {pipeline_mode = #tpu.pipeline_mode<synchronous>, transform_indices = @transform_6, window_bounds = array<i64: 1, 512>}, {pipeline_mode = #tpu.pipeline_mode<synchronous>, transform_indices = @transform_7, window_bounds = array<i64: 1, 512>}, {transform_indices = @transform_8, window_bounds = array<i64: 1, 1>}, {transform_indices = @transform_9, window_bounds = array<i64: 16, 384>}, {pipeline_mode = #tpu.pipeline_mode<synchronous>, transform_indices = @transform_10, window_bounds = array<i64: 1, 384>}, {pipeline_mode = #tpu.pipeline_mode<synchronous>, transform_indices = @transform_11, window_bounds = array<i64: 1, 384>}]} {
    %0 = tpu.iota {dimensions = array<i32: 1>} : vector<16x64xi32>
    %c0 = arith.constant 0 : index
    %c0_0 = arith.constant 0 : index
    %1 = vector.load %arg1[%c0, %c0_0] : memref<16x1xi32, #tpu.memory_space<vmem>>, vector<16x1xi32>
    %2 = vector.broadcast %1 : vector<16x1xi32> to vector<16x64xi32>
    %3 = arith.cmpi eq, %0, %2 : vector<16x64xi32>
    %4 = arith.extui %3 : vector<16x64xi1> to vector<16x64xi32>
    %5 = arith.sitofp %4 : vector<16x64xi32> to vector<16x64xf32>
    %6 = arith.truncf %5 : vector<16x64xf32> to vector<16x64xbf16>
    %c0_1 = arith.constant 0 : index
    %c0_2 = arith.constant 0 : index
    %7 = vector.load %arg4[%c0_1, %c0_2] : memref<64x32xbf16, #tpu.memory_space<vmem>>, vector<64x32xbf16>
    %cst = arith.constant dense<0.000000e+00> : vector<16x32xf32>
    %8 = tpu.matmul %6, %7, %cst {dimension_numbers = #tpu.dot_dimension_numbers<[1], [0], [0], [1], [0, 0, 1, 1], [], []>} : vector<16x64xbf16>, vector<64x32xbf16>, vector<16x32xf32> -> vector<16x32xf32>
    %9 = arith.truncf %8 : vector<16x32xf32> to vector<16x32xbf16>
    %10 = tpu.iota {dimensions = array<i32: 1>} : vector<16x16xi32>
    %c0_3 = arith.constant 0 : index
    %c0_4 = arith.constant 0 : index
    %11 = vector.load %arg2[%c0_3, %c0_4] : memref<16x1xi32, #tpu.memory_space<vmem>>, vector<16x1xi32>
    %12 = vector.broadcast %11 : vector<16x1xi32> to vector<16x16xi32>
    %13 = arith.cmpi eq, %10, %12 : vector<16x16xi32>
    %14 = arith.extui %13 : vector<16x16xi1> to vector<16x16xi32>
    %15 = arith.sitofp %14 : vector<16x16xi32> to vector<16x16xf32>
    %16 = arith.truncf %15 : vector<16x16xf32> to vector<16x16xbf16>
    %c0_5 = arith.constant 0 : index
    %c0_6 = arith.constant 0 : index
    %17 = vector.load %arg5[%c0_5, %c0_6] : memref<16x32xbf16, #tpu.memory_space<vmem>>, vector<16x32xbf16>
    %cst_7 = arith.constant dense<0.000000e+00> : vector<16x32xf32>
    %18 = tpu.matmul %16, %17, %cst_7 {dimension_numbers = #tpu.dot_dimension_numbers<[1], [0], [0], [1], [0, 0, 1, 1], [], []>} : vector<16x16xbf16>, vector<16x32xbf16>, vector<16x32xf32> -> vector<16x32xf32>
    %19 = arith.truncf %18 : vector<16x32xf32> to vector<16x32xbf16>
    %20 = tpu.iota {dimensions = array<i32: 1>} : vector<16x64xi32>
    %c0_8 = arith.constant 0 : index
    %c0_9 = arith.constant 0 : index
    %21 = vector.load %arg3[%c0_8, %c0_9] : memref<16x1xi32, #tpu.memory_space<vmem>>, vector<16x1xi32>
    %22 = vector.broadcast %21 : vector<16x1xi32> to vector<16x64xi32>
    %23 = arith.cmpi eq, %20, %22 : vector<16x64xi32>
    %24 = arith.extui %23 : vector<16x64xi1> to vector<16x64xi32>
    %25 = arith.sitofp %24 : vector<16x64xi32> to vector<16x64xf32>
    %26 = arith.truncf %25 : vector<16x64xf32> to vector<16x64xbf16>
    %c0_10 = arith.constant 0 : index
    %c0_11 = arith.constant 0 : index
    %27 = vector.load %arg4[%c0_10, %c0_11] : memref<64x32xbf16, #tpu.memory_space<vmem>>, vector<64x32xbf16>
    %cst_12 = arith.constant dense<0.000000e+00> : vector<16x32xf32>
    %28 = tpu.matmul %26, %27, %cst_12 {dimension_numbers = #tpu.dot_dimension_numbers<[1], [0], [0], [1], [0, 0, 1, 1], [], []>} : vector<16x64xbf16>, vector<64x32xbf16>, vector<16x32xf32> -> vector<16x32xf32>
    %29 = arith.truncf %28 : vector<16x32xf32> to vector<16x32xbf16>
    %c0_13 = arith.constant 0 : index
    %c0_14 = arith.constant 0 : index
    %30 = vector.load %arg6[%c0_13, %c0_14] : memref<96x512xbf16, #tpu.memory_space<vmem>>, vector<32x512xbf16>
    %cst_15 = arith.constant dense<0.000000e+00> : vector<16x512xf32>
    %31 = tpu.matmul %9, %30, %cst_15 {dimension_numbers = #tpu.dot_dimension_numbers<[1], [0], [0], [1], [0, 0, 1, 1], [], []>} : vector<16x32xbf16>, vector<32x512xbf16>, vector<16x512xf32> -> vector<16x512xf32>
    %c32 = arith.constant 32 : index
    %c0_16 = arith.constant 0 : index
    %32 = vector.load %arg6[%c32, %c0_16] : memref<96x512xbf16, #tpu.memory_space<vmem>>, vector<32x512xbf16>
    %cst_17 = arith.constant dense<0.000000e+00> : vector<16x512xf32>
    %33 = tpu.matmul %19, %32, %cst_17 {dimension_numbers = #tpu.dot_dimension_numbers<[1], [0], [0], [1], [0, 0, 1, 1], [], []>} : vector<16x32xbf16>, vector<32x512xbf16>, vector<16x512xf32> -> vector<16x512xf32>
    %34 = arith.addf %31, %33 : vector<16x512xf32>
    %c64 = arith.constant 64 : index
    %c0_18 = arith.constant 0 : index
    %35 = vector.load %arg6[%c64, %c0_18] : memref<96x512xbf16, #tpu.memory_space<vmem>>, vector<32x512xbf16>
    %cst_19 = arith.constant dense<0.000000e+00> : vector<16x512xf32>
    %36 = tpu.matmul %29, %35, %cst_19 {dimension_numbers = #tpu.dot_dimension_numbers<[1], [0], [0], [1], [0, 0, 1, 1], [], []>} : vector<16x32xbf16>, vector<32x512xbf16>, vector<16x512xf32> -> vector<16x512xf32>
    %37 = arith.addf %34, %36 : vector<16x512xf32>
    %c0_20 = arith.constant 0 : index
    %c0_21 = arith.constant 0 : index
    %38 = vector.load %arg7[%c0_20, %c0_21] : memref<1x512xf32, #tpu.memory_space<vmem>>, vector<1x512xf32>
    %39 = vector.broadcast %38 : vector<1x512xf32> to vector<16x512xf32>
    %40 = arith.addf %37, %39 : vector<16x512xf32>
    %cst_22 = arith.constant 0.000000e+00 : f32
    %41 = vector.broadcast %cst_22 : f32 to vector<16x512xf32>
    %42 = arith.maximumf %40, %41 : vector<16x512xf32>
    %c0_23 = arith.constant 0 : index
    %c0_24 = arith.constant 0 : index
    %43 = vector.load %arg8[%c0_23, %c0_24] : memref<1x512xf32, #tpu.memory_space<vmem>>, vector<1x512xf32>
    %cst_25 = arith.constant dense<0.000000e+00> : vector<1x16xf32>
    %44 = tpu.matmul %43, %42, %cst_25 {dimension_numbers = #tpu.dot_dimension_numbers<[1], [1], [0], [0], [0, 0, 1, 0], [], []>} : vector<1x512xf32>, vector<16x512xf32>, vector<1x16xf32> -> vector<1x16xf32>
    %c0_26 = arith.constant 0 : index
    %c0_27 = arith.constant 0 : index
    %45 = memref.load %arg9[%c0_26, %c0_27] : memref<1x1xf32, #tpu.memory_space<smem>>
    %46 = vector.broadcast %45 : f32 to vector<1x16xf32>
    %47 = arith.addf %44, %46 : vector<1x16xf32>
    %48 = tpu.iota {dimensions = array<i32: 1>} : vector<1x16xi32>
    %c8_i32 = arith.constant 8 : i32
    %49 = vector.broadcast %c8_i32 : i32 to vector<1x16xi32>
    %50 = arith.cmpi slt, %48, %49 : vector<1x16xi32>
    %cst_28 = arith.constant 0.000000e+00 : f32
    %51 = vector.broadcast %cst_28 : f32 to vector<1x16xf32>
    %52 = arith.select %50, %47, %51 : vector<1x16xi1>, vector<1x16xf32>
    %53 = arith.truncf %52 : vector<1x16xf32> to vector<1x16xbf16>
    %c0_29 = arith.constant 0 : index
    %c0_30 = arith.constant 0 : index
    %54 = vector.load %arg10[%c0_29, %c0_30] : memref<16x384xbf16, #tpu.memory_space<vmem>>, vector<16x384xbf16>
    %cst_31 = arith.constant dense<0.000000e+00> : vector<1x384xf32>
    %55 = tpu.matmul %53, %54, %cst_31 {dimension_numbers = #tpu.dot_dimension_numbers<[1], [0], [0], [1], [0, 0, 1, 1], [], []>} : vector<1x16xbf16>, vector<16x384xbf16>, vector<1x384xf32> -> vector<1x384xf32>
    %c0_32 = arith.constant 0 : index
    %c0_33 = arith.constant 0 : index
    %56 = vector.load %arg11[%c0_32, %c0_33] : memref<1x384xf32, #tpu.memory_space<vmem>>, vector<1x384xf32>
    %57 = arith.addf %55, %56 : vector<1x384xf32>
    %58 = arith.negf %57 : vector<1x384xf32>
    %59 = math.exp %58 : vector<1x384xf32>
    %cst_34 = arith.constant 1.000000e+00 : f32
    %60 = vector.broadcast %cst_34 : f32 to vector<1x384xf32>
    %61 = arith.addf %60, %59 : vector<1x384xf32>
    %62 = arith.divf %60, %61 : vector<1x384xf32>
    %c0_35 = arith.constant 0 : index
    %c0_36 = arith.constant 0 : index
    %63 = vector.load %arg12[%c0_35, %c0_36] : memref<1x384xf32, #tpu.memory_space<vmem>>, vector<1x384xf32>
    tpu.vector_store %arg12[%c0_35, %c0_36], %62 {strides = array<i32>} : memref<1x384xf32, #tpu.memory_space<vmem>>, vector<1x384xf32>,
    return
  }
  func.func @transform_0(%arg0: i32) -> (i32, i32) {
    %c0_i32 = arith.constant 0 : i32
    %c0_i32_0 = arith.constant 0 : i32
    %c0_i32_1 = arith.constant 0 : i32
    return %c0_i32, %c0_i32_0 : i32, i32
  }
  func.func @transform_1(%arg0: i32) -> (i32, i32) {
    %c0_i32 = arith.constant 0 : i32
    %c0_i32_0 = arith.constant 0 : i32
    %c0_i32_1 = arith.constant 0 : i32
    return %c0_i32, %c0_i32_0 : i32, i32
  }
  func.func @transform_2(%arg0: i32) -> (i32, i32) {
    %c0_i32 = arith.constant 0 : i32
    %c0_i32_0 = arith.constant 0 : i32
    %c0_i32_1 = arith.constant 0 : i32
    return %c0_i32, %c0_i32_0 : i32, i32
  }
  func.func @transform_3(%arg0: i32) -> (i32, i32) {
    %c0_i32 = arith.constant 0 : i32
    %c0_i32_0 = arith.constant 0 : i32
    %c0_i32_1 = arith.constant 0 : i32
    return %c0_i32, %c0_i32_0 : i32, i32
  }
  func.func @transform_4(%arg0: i32) -> (i32, i32) {
    %c0_i32 = arith.constant 0 : i32
    %c0_i32_0 = arith.constant 0 : i32
    %c0_i32_1 = arith.constant 0 : i32
    return %c0_i32, %c0_i32_0 : i32, i32
  }
  func.func @transform_5(%arg0: i32) -> (i32, i32) {
    %c0_i32 = arith.constant 0 : i32
    %c0_i32_0 = arith.constant 0 : i32
    %c0_i32_1 = arith.constant 0 : i32
    return %c0_i32, %c0_i32_0 : i32, i32
  }
  func.func @transform_6(%arg0: i32) -> (i32, i32) {
    %c0_i32 = arith.constant 0 : i32
    %c0_i32_0 = arith.constant 0 : i32
    %c0_i32_1 = arith.constant 0 : i32
    return %c0_i32, %c0_i32_0 : i32, i32
  }
  func.func @transform_7(%arg0: i32) -> (i32, i32) {
    %c0_i32 = arith.constant 0 : i32
    %c0_i32_0 = arith.constant 0 : i32
    %c0_i32_1 = arith.constant 0 : i32
    return %c0_i32, %c0_i32_0 : i32, i32
  }
  func.func @transform_8(%arg0: i32) -> (i32, i32) {
    %c0_i32 = arith.constant 0 : i32
    %c0_i32_0 = arith.constant 0 : i32
    %c0_i32_1 = arith.constant 0 : i32
    return %c0_i32, %c0_i32_0 : i32, i32
  }
  func.func @transform_9(%arg0: i32) -> (i32, i32) {
    %c0_i32 = arith.constant 0 : i32
    %c0_i32_0 = arith.constant 0 : i32
    %c0_i32_1 = arith.constant 0 : i32
    return %c0_i32, %c0_i32_0 : i32, i32
  }
  func.func @transform_10(%arg0: i32) -> (i32, i32) {
    %c0_i32 = arith.constant 0 : i32
    %c0_i32_0 = arith.constant 0 : i32
    %c0_i32_1 = arith.constant 0 : i32
    return %c0_i32, %c0_i32_0 : i32, i32
  }
  func.func @transform_11(%arg0: i32) -> (i32, i32) {
    %c0_i32 = arith.constant 0 : i32
    %c0_i32_0 = arith.constant 0 : i32
    %c0_i32_1 = arith.constant 0 : i32
    return %c0_i32, %c0_i32_0 : i32, i32
  }
}

</mosaic_0001>

<bundles_post_ra>
// kernel: baseline_embeddings_only_forward.1
= control target key start
LH: loop header
LB: loop body
LE: loop exit
PB: predicated region body
PF: predicated region fallthrough
CT: control target
= control target key end

     0   :  { %17 = vsyncpa [#allocation4], 0  ;;  %s1517_s0 = inlined_call_operand.vmem [shape: s32[16,1], index: 0, kind: input, shape index: {}]   ;;  %s1518_s1 = inlined_call_operand.vmem [shape: s32[16,1], index: 1, kind: input, shape index: {}]   ;;  %s1519_s2 = inlined_call_operand.vmem [shape: s32[16,1], index: 2, kind: input, shape index: {}]   ;;  %s1520_s3 = inlined_call_operand.vmem [shape: bf16[64,32], index: 3, kind: input, shape index: {}]   ;;  %s1521_s4 = inlined_call_operand.vmem [shape: bf16[16,32], index: 4, kind: input, shape index: {}]   ;;  %s1522_s5 = inlined_call_operand.hbm [shape: bf16[96,512], index: 5, kind: input, shape index: {}]   ;;  %s1523_s6 = inlined_call_operand.vmem [shape: f32[1,512], index: 6, kind: input, shape index: {}]   ;;  %s1524_s7 = inlined_call_operand.vmem [shape: f32[1,512], index: 7, kind: input, shape index: {}]   ;;  %s1525_s8 = inlined_call_operand.<no memory space> [shape: f32[1,1], index: 8, kind: input, shape index: {}]   ;;  %s1526_s9 = inlined_call_operand.hbm [shape: bf16[336,384], index: 9, kind: input, shape index: {}]   ;;  %s1527_s10 = inlined_call_operand.vmem [shape: f32[1,384], index: 10, kind: input, shape index: {}]   ;;  %s1528_s11 = inlined_call_operand.vmem [shape: f32[1,384], index: 11, kind: output, shape index: {}]  }
   0x1   :  { %18 = vsyncpa [#allocation6], 0  ;;  %s1309_s17 = smov [#allocation3]  }
   0x2   :  { %s34_s18 = sshll.u32 %s1309_s17, 4  ;;  %s35_s18 = int_to_ptr.vmem [resolvable:$true] %s34_s18 }
   0x3   :  { %s1273_s19 = scalar_lea.vmem %s35_s18, 3072  ;;  %p1278_p1 = scmp.lt.s32.totalorder %s35_s18, %s35_s18 }
   0x4   :  { %p1274_p0 = scmp.ne.s32.totalorder %s35_s18, %s1273_s19  ;;  %p1279_p2 = scmp.lt.s32.totalorder %s1273_s19, %s1273_s19 }
   0x6   :  { %p1280_p3 = por %p1279_p2, %p1278_p1 }
   0x8   :  { %p1281_p4 = pnand %p1280_p3, %p1274_p0 }
   0xa   :  { %1284 = shalt.err (!%p1281_p4)
}
   0xb   :  { %s1310_s20 = smov 256   ;;  %s1311_s21 = smov 16  }
   0xc   :  { %40 = dma.hbm_to_vmem [thread:$0]  %s1522_s5, 3072, %s35_s18, [#allocation4], %s1310_s20, %s1310_s20, %s1311_s21  }
   0xd   :  { %s1312_s24 = smov [#allocation5]  }
   0xe   :  { %s52_s25 = sshll.u32 %s1312_s24, 4  ;;  %s53_s25 = int_to_ptr.vmem [resolvable:$true] %s52_s25 }
   0xf   :  { %s1293_s26 = scalar_lea.vmem %s53_s25, 384  ;;  %p1298_p6 = scmp.lt.s32.totalorder %s53_s25, %s53_s25 }
  0x10   :  { %p1294_p5 = scmp.ne.s32.totalorder %s53_s25, %s1293_s26  ;;  %p1299_p7 = scmp.lt.s32.totalorder %s1293_s26, %s1293_s26 }
  0x12   :  { %p1300_p8 = por %p1299_p7, %p1298_p6 }
  0x14   :  { %p1301_p9 = pnand %p1300_p8, %p1294_p5 }
  0x16   :  { %1304 = shalt.err (!%p1301_p9)
}
  0x17   :  { %s1313_s27 = smov 192   ;;  %s1314_s28 = smov 12  }
  0x18   :  { %58 = dma.hbm_to_vmem [thread:$0]  %s1526_s9, 384, %s53_s25, [#allocation6], %s1313_s27, %s1313_s27, %s1314_s28  }
  0x19   :  { %1305 = dma.done.wait [#allocation4], 3072  }
  0x1a   :  { %1306 = vsyncadd [#allocation4], 4294964224 }
  0x1b   :  { %1307 = dma.done.wait [#allocation6], 384  }
  0x1c   :  { %1308 = vsyncadd [#allocation6], 4294966912  ;;  %v1315_v0 = vmov 0   ;;  %v1316_v1 = vmov 0.0   ;;  %v163_v2 = vld [vmem:[%s1518_s1] sm:$0xff]  ;;  %v164_v4 = vld [vmem:[%s1518_s1 + $0x8] sm:$0xff]  ;;  %v68_v14 = vlaneseq }
  0x1d   :  { %1207 = vset.pattern.permute.xlu1 %v1315_v0  ;;  %1206 = vset.pattern.permute.xlu0 %v1315_v0  ;;  %v70_v3 = vld [vmem:[%s1517_s0] sm:$0xff]  ;;  %v71_v5 = vld [vmem:[%s1517_s0 + $0x8] sm:$0xff]  ;;  %v1208_v6 = vld [vmem:[%s1520_s3 + $0x18] sm:$0xff]   ;;  %vm1317_vm0 = vmmov 0   ;;  %vm117_vm5 = vcmask 523264   ;;  %vm186_vm6 = vcmask 130048  }
  0x1e   :  { %1160 = vmatprep.subr.bf16.mxu0 %v1316_v1  ;;  %1172 = vmatprep.subr.bf16.mxu1 %v1316_v1  ;;  %v232_v7 = vld [vmem:[%s1519_s2] sm:$0xff]  ;;  %v233_v8 = vld [vmem:[%s1519_s2 + $0x8] sm:$0xff]  ;;  %v1209_v9 = vld [vmem:[%s1520_s3 + $0x10] sm:$0xff]   ;;  %v1431_v15 = vand.u32 127, %v68_v14  ;;  %vm348_vm9 = vcmask 261120   ;;  %vm1085_vm11 = vcmp.lt.s32.totalorder %v68_v14, 384 }
  0x1f   :  { %166 = vperm.xlu0 %1206, %v163_v2   ;;  %73 = vperm.xlu1 %1207, %v70_v3   ;;  %v1211_v10 = vld [vmem:[%s1521_s4] sm:$0xff]   ;;  %v1210_v11 = vld [vmem:[%s1520_s3 + $0x8] sm:$0xff]  }
  0x20   :  { %1161 = vmatpush3.bf16.msra.mxu0 %v1208_v6  ;;  %1168 = vmatprep.mubr.msk.bf16.mxu0 %vm1317_vm0, %v1316_v1  ;;  %v1212_v12 = vld [vmem:[%s1520_s3] sm:$0xff]   ;;  %v1218_v29 = vld [vmem:[#allocation3 + $0x6c] ss:$16 sps:$4 sm:$0xff]   ;;  %v1216_v32 = vld [vmem:[#allocation3 + $0x68] ss:$16 sps:$4 sm:$0xff]   ;;  %vm914_vm10 = vcmp.lt.s32.totalorder %v1431_v15, 8 }
  0x21   :  { %1162 = vmatprep.subr.bf16.mxu0 %v1316_v1  ;;  %1174 = vmatprep.mubr.msk.bf16.mxu1 %vm1317_vm0, %v1316_v1  ;;  %v1215_v13 = vld [vmem:[#allocation3 + $0x64] ss:$16 sps:$4 sm:$0xff]   ;;  %v1213_v26 = vld [vmem:[#allocation3 + $0x60] ss:$16 sps:$4 sm:$0xff]   ;;  %v1222_v36 = vld [vmem:[#allocation3 + $0x48] ss:$16 sps:$4 sm:$0xff]  }
  0x22   :  { %1173 = vmatpush3.bf16.msra.mxu1 %v1211_v10  ;;  %v1219_v34 = vld [vmem:[#allocation3 + $0x40] ss:$16 sps:$4 sm:$0xff]   ;;  %v1221_v35 = vld [vmem:[#allocation3 + $0x44] ss:$16 sps:$4 sm:$0xff]   ;;  %v1224_v37 = vld [vmem:[#allocation3 + $0x4c] ss:$16 sps:$4 sm:$0xff]  }
  0x23   :  { %169 = vperm.xlu0 %1206, %v164_v4   ;;  %76 = vperm.xlu1 %1207, %v71_v5   ;;  %v1227_v38 = vld [vmem:[#allocation3 + $0x24] ss:$16 sps:$4 sm:$0xff]   ;;  %v1230_v39 = vld [vmem:[#allocation3 + $0x2c] ss:$16 sps:$4 sm:$0xff]   ;;  %v1225_v46 = vld [vmem:[#allocation3 + $0x20] ss:$16 sps:$4 sm:$0xff]  }
  0x24   :  { %1163 = vmatpush3.bf16.msra.mxu0 %v1209_v9  ;;  %1178 = vmatprep.subr.bf16.mxu1 %v1316_v1  ;;  %v1228_v47 = vld [vmem:[#allocation3 + $0x28] ss:$16 sps:$4 sm:$0xff]   ;;  %v1233_v49 = vld [vmem:[#allocation3 + $0x4] ss:$16 sps:$4 sm:$0xff]   ;;  %v1236_v50 = vld [vmem:[#allocation3 + $0xc] ss:$16 sps:$4 sm:$0xff]  }
  0x25   :  { %1164 = vmatprep.subr.bf16.mxu0 %v1316_v1  ;;  %v1231_v53 = vld [vmem:[#allocation3] ss:$16 sps:$4 sm:$0xff]   ;;  %v1234_v54 = vld [vmem:[#allocation3 + $0x8] ss:$16 sps:$4 sm:$0xff]   ;;  %v1239_v55 = vld [vmem:[#allocation3 + $0xa4] ss:$16 sps:$4 sm:$0xff]  }
  0x26   :  { %v1242_v56 = vld [vmem:[#allocation3 + $0xac] ss:$16 sps:$4 sm:$0xff]   ;;  %v1237_v57 = vld [vmem:[#allocation3 + $0xa0] ss:$16 sps:$4 sm:$0xff]   ;;  %v1240_v58 = vld [vmem:[#allocation3 + $0xa8] ss:$16 sps:$4 sm:$0xff]  }
  0x27   :  { %235 = vperm.xlu0 %1206, %v232_v7   ;;  %238 = vperm.xlu1 %1207, %v233_v8   ;;  %v1245_v60 = vld [vmem:[#allocation3 + $0x84] ss:$16 sps:$4 sm:$0xff]   ;;  %v1248_v61 = vld [vmem:[#allocation3 + $0x8c] ss:$16 sps:$4 sm:$0xff]   ;;  %v1243_v63 = vld [vmem:[#allocation3 + $0x80] ss:$16 sps:$4 sm:$0xff]  }
  0x28   :  { %1165 = vmatpush3.bf16.msra.mxu0 %v1210_v11  ;;  %v1246_v2 = vld [vmem:[#allocation3 + $0x88] ss:$16 sps:$4 sm:$0xff]   ;;  %v1466_v7 = vshrl.u32 %v68_v14, 7  ;;  %v1475_v10 = vld [vmem:[%s1524_s7] sm:$0xf] }
  0x29   :  { %1166 = vmatprep.subr.bf16.mxu0 %v1316_v1 }
  0x2a   :  { %v1469_v8 = vsub.s32 1, %v1466_v7 }
  0x2c   :  { %1167 = vmatpush3.bf16.msra.mxu0 %v1212_v12 }
  0x2d   :  { %364 = vmatprep.subr.bf16.mxu0 %v1215_v13 }
  0x9a   :  { %v167_v16 = vpop.permute.xlu0 %166  ;;  %v74_v17 = vpop.permute.xlu1 %73 }
  0x9b   :  { %vm78_vm1 = vcmp.eq.s32.totalorder %v1431_v15, %v74_v17  ;;  %vm171_vm2 = vcmp.eq.s32.totalorder %v1431_v15, %v167_v16 }
  0x9c   :  { %v1094_v18 = vsel %vm78_vm1, 1.0, %v1316_v1  ;;  %v1101_v21 = vsel %vm171_vm2, 1.0, %v1316_v1 }
  0x9e   :  { %v170_v19 = vpop.permute.xlu0 %169  ;;  %v77_v20 = vpop.permute.xlu1 %76 }
  0x9f   :  { %vm172_vm3 = vcmp.eq.s32.totalorder %v1431_v15, %v170_v19  ;;  %vm79_vm4 = vcmp.eq.s32.totalorder %v1431_v15, %v77_v20 }
  0xa0   :  { %v1102_v22 = vsel %vm172_vm3, 1.0, %v1316_v1  ;;  %v1095_v23 = vsel %vm79_vm4, 1.0, %v1316_v1 }
  0xa1   :  { %v177_v24 = vpack.c.bf16 %v1102_v22, %v1101_v21  ;;  %v84_v25 = vpack.c.bf16 %v1095_v23, %v1094_v18 }
  0xa2   :  { %v236_v27 = vpop.permute.xlu0 %235  ;;  %v239_v28 = vpop.permute.xlu1 %238 }
  0xa3   :  { %1169 = vmatmul.mubr.msk.bf16.vlgmr.msra.gmra.mxu0 %vm117_vm5, %v84_v25  ;;  %1175 = vmatmul.mubr.msk.bf16.vlgmr.msra.gmra.mxu1 %vm186_vm6, %v177_v24  ;;  %vm240_vm7 = vcmp.eq.s32.totalorder %v1431_v15, %v236_v27  ;;  %vm241_vm8 = vcmp.eq.s32.totalorder %v1431_v15, %v239_v28 }
  0xa4   :  { %1179 = vmatpush3.bf16.msra.mxu1 %v1208_v6  ;;  %1186 = vmatprep.mubr.msk.bf16.mxu1 %vm1317_vm0, %v1316_v1  ;;  %v1105_v30 = vsel %vm240_vm7, 1.0, %v1316_v1  ;;  %v1106_v31 = vsel %vm241_vm8, 1.0, %v1316_v1 }
  0xa5   :  { %1180 = vmatprep.subr.bf16.mxu1 %v1316_v1  ;;  %365 = vmatpush1.bf16.msra.mxu0 %v1213_v26  ;;  %v246_v33 = vpack.c.bf16 %v1106_v31, %v1105_v30  ;;  %v1481_v31 = vsub.s32 0, %v1466_v7 }
  0xa6   :  { %384 = vmatprep.mubr.bf16.mxu0 %v1315_v0  ;;  %366 = vmatprep.subr.bf16.mxu0 %v1221_v35 }
  0xa8   :  { %1181 = vmatpush3.bf16.msra.mxu1 %v1209_v9  ;;  %v728_v9 = vsub.s32 3, %v1466_v7 }
  0xa9   :  { %1182 = vmatprep.subr.bf16.mxu1 %v1316_v1  ;;  %367 = vmatpush1.bf16.msra.mxu0 %v1219_v34  ;;  %v712_v34 = vld [vmem:[%s1523_s6] sm:$0xf] }
  0xaa   :  { %493 = vmatprep.subr.bf16.mxu0 %v1227_v38 }
  0xac   :  { %1183 = vmatpush3.bf16.msra.mxu1 %v1210_v11  ;;  %v761_v11 = vrot.slane %v1475_v10, %v1469_v8 }
  0xad   :  { %1184 = vmatprep.subr.bf16.mxu1 %v1316_v1 }
  0xb0   :  { %1185 = vmatpush3.bf16.msra.mxu1 %v1212_v12  ;;  %v769_v12 = vrot.slane %v1475_v10, %v728_v9 }
  0xb1   :  { %407 = vmatprep.subr.bf16.mxu1 %v1218_v29 }
  0xb3   :  { %1187 = vmatmul.mubr.msk.bf16.vlgmr.msra.gmra.mxu1 %vm117_vm5, %v246_v33 }
  0xb4   :  { %408 = vmatpush1.bf16.msra.mxu1 %v1216_v32  ;;  %427 = vmatprep.mubr.bf16.mxu1 %v1315_v0  ;;  %v1484_v32 = vsub.s32 2, %v1466_v7 }
  0xb5   :  { %409 = vmatprep.subr.bf16.mxu1 %v1224_v37 }
  0xb8   :  { %410 = vmatpush1.bf16.msra.mxu1 %v1222_v36 }
  0xb9   :  { %536 = vmatprep.subr.bf16.mxu1 %v1230_v39 }
 0x163   :  { %v155_v40 = vpop.f32.mrf.mxu0  ;;  %v224_v41 = vpop.f32.mrf.mxu1 }
 0x165   :  { %v1170_v42 = vpop.f32.mrf.mxu0  ;;  %v1176_v43 = vpop.f32.mrf.mxu1 }
 0x167   :  { %v158_v44 = vpop.f32.mrf.mxu0  ;;  %v227_v45 = vpop.f32.mrf.mxu1 }
 0x168   :  { %v231_v48 = vpack.c.bf16 %v227_v45, %v224_v41  ;;  %v162_v59 = vpack.c.bf16 %v158_v44, %v155_v40  ;;  %v717_v40 = vrot.slane %v712_v34, %v1481_v31  ;;  %v725_v41 = vrot.slane %v712_v34, %v1484_v32 }
 0x169   :  { %v1171_v51 = vpop.f32.mrf.mxu0  ;;  %v1177_v52 = vpop.f32.mrf.mxu1  ;;  %v721_v44 = vrot.slane %v712_v34, %v1469_v8  ;;  %v729_v45 = vrot.slane %v712_v34, %v728_v9  ;;  %v921_v34 = vld [vmem:[%s1527_s10] sm:$0x7] }
 0x16a   :  { %1116 = vmatmul.mubr.msk.bf16.vlgmr.msra.gmra.mxu0 %vm348_vm9, %v231_v48  ;;  %1117 = vmatmul.mubr.msk.bf16.vlgmr.msra.gmra.mxu1 %vm348_vm9, %v231_v48 }
 0x16b   :  { %494 = vmatpush1.bf16.msra.mxu0 %v1225_v46  ;;  %537 = vmatpush1.bf16.msra.mxu1 %v1228_v47 }
 0x16c   :  { %495 = vmatprep.subr.bf16.mxu0 %v1233_v49  ;;  %538 = vmatprep.subr.bf16.mxu1 %v1236_v50 }
 0x16d   :  { %513 = vmatprep.mubr.bf16.mxu0 %v1315_v0  ;;  %556 = vmatprep.mubr.bf16.mxu1 %v1315_v0 }
 0x16f   :  { %496 = vmatpush1.bf16.msra.mxu0 %v1231_v53  ;;  %539 = vmatpush1.bf16.msra.mxu1 %v1234_v54 }
 0x170   :  { %630 = vmatprep.subr.bf16.mxu0 %v1239_v55  ;;  %673 = vmatprep.subr.bf16.mxu1 %v1242_v56 }
 0x172   :  { %1126 = vmatmul.mubr.msk.bf16.vlgmr.msra.gmra.mxu0 %vm348_vm9, %v162_v59  ;;  %1127 = vmatmul.mubr.msk.bf16.vlgmr.msra.gmra.mxu1 %vm348_vm9, %v162_v59 }
 0x173   :  { %v284_v62 = vpop.f32.mrf.mxu1  ;;  %631 = vmatpush1.bf16.msra.mxu0 %v1237_v57  ;;  %674 = vmatpush1.bf16.msra.mxu1 %v1240_v58 }
 0x174   :  { %632 = vmatprep.subr.bf16.mxu0 %v1245_v60  ;;  %675 = vmatprep.subr.bf16.mxu1 %v1248_v61 }
 0x175   :  { %v1188_v3 = vpop.f32.mrf.mxu1  ;;  %650 = vmatprep.mubr.bf16.mxu0 %v1315_v0  ;;  %693 = vmatprep.mubr.bf16.mxu1 %v1315_v0 }
 0x177   :  { %v287_v4 = vpop.f32.mrf.mxu1  ;;  %633 = vmatpush1.bf16.msra.mxu0 %v1243_v63  ;;  %676 = vmatpush1.bf16.msra.mxu1 %v1246_v2 }
 0x178   :  { %v291_v5 = vpack.c.bf16 %v287_v4, %v284_v62 }
 0x179   :  { %v1189_v6 = vpop.f32.mrf.mxu1 }
 0x17a   :  { %1136 = vmatmul.mubr.msk.bf16.vlgmr.msra.gmra.mxu0 %vm348_vm9, %v291_v5  ;;  %1137 = vmatmul.mubr.msk.bf16.vlgmr.msra.gmra.mxu1 %vm348_vm9, %v291_v5 }
 0x17b   :  { %838 = vmatprep.mubr.f32.mxu0 %v761_v11  ;;  %908 = vmatprep.mubr.f32.mxu1 %v769_v12 }
 0x22a   :  { %v386_v13 = vpop.f32.mrf.mxu0  ;;  %v429_v16 = vpop.f32.mrf.mxu1 }
 0x22c   :  { %v388_v17 = vpop.f32.mrf.mxu0  ;;  %v431_v18 = vpop.f32.mrf.mxu1 }
 0x22e   :  { %v390_v19 = vpop.f32.mrf.mxu0  ;;  %v433_v20 = vpop.f32.mrf.mxu1 }
 0x230   :  { %v392_v21 = vpop.f32.mrf.mxu0  ;;  %v435_v22 = vpop.f32.mrf.mxu1 }
 0x232   :  { %v515_v23 = vpop.f32.mrf.mxu0  ;;  %v558_v24 = vpop.f32.mrf.mxu1 }
 0x233   :  { %v516_v52 = vadd.f32 %v515_v23, %v386_v13  ;;  %v559_v53 = vadd.f32 %v558_v24, %v429_v16  ;;  %v1251_v23 = vld [vmem:[#allocation5 + $0x4] ss:$12 sps:$4 sm:$0xff]   ;;  %v1249_v24 = vld [vmem:[#allocation5] ss:$12 sps:$4 sm:$0xff]  }
 0x234   :  { %v517_v25 = vpop.f32.mrf.mxu0  ;;  %v560_v26 = vpop.f32.mrf.mxu1 }
 0x235   :  { %v518_v38 = vadd.f32 %v517_v25, %v388_v17  ;;  %v561_v39 = vadd.f32 %v560_v26, %v431_v18  ;;  %v1252_v25 = vld [vmem:[#allocation5 + $0x8] ss:$12 sps:$4 sm:$0xff]  }
 0x236   :  { %v519_v27 = vpop.f32.mrf.mxu0  ;;  %v562_v28 = vpop.f32.mrf.mxu1 }
 0x237   :  { %v520_v42 = vadd.f32 %v519_v27, %v390_v19  ;;  %v563_v43 = vadd.f32 %v562_v28, %v433_v20 }
 0x238   :  { %v521_v29 = vpop.f32.mrf.mxu0  ;;  %v564_v30 = vpop.f32.mrf.mxu1 }
 0x239   :  { %v522_v48 = vadd.f32 %v521_v29, %v392_v21  ;;  %v565_v49 = vadd.f32 %v564_v30, %v435_v22  ;;  %v757_v21 = vrot.slane %v1475_v10, %v1481_v31  ;;  %v765_v22 = vrot.slane %v1475_v10, %v1484_v32 }
 0x23a   :  { %v652_v33 = vpop.f32.mrf.mxu0  ;;  %v695_v35 = vpop.f32.mrf.mxu1  ;;  %v752_v10 = vstv %s1525_s8 }
 0x23b   :  { %v704_v60 = vadd.f32 %v652_v33, %v516_v52  ;;  %v706_v61 = vadd.f32 %v695_v35, %v559_v53  ;;  %v942_v35 = vrot.slane %v921_v34, %v1481_v31 }
 0x23c   :  { %v654_v36 = vpop.f32.mrf.mxu0  ;;  %v697_v37 = vpop.f32.mrf.mxu1 }
 0x23d   :  { %v705_v50 = vadd.f32 %v654_v36, %v518_v38  ;;  %v707_v51 = vadd.f32 %v697_v37, %v561_v39  ;;  %v734_v11 = vadd.f32 %v717_v40, %v704_v60  ;;  %v736_v12 = vadd.f32 %v725_v41, %v706_v61 }
 0x23e   :  { %v656_v46 = vpop.f32.mrf.mxu0  ;;  %v699_v47 = vpop.f32.mrf.mxu1  ;;  %v950_v36 = vrot.slane %v921_v34, %v1484_v32  ;;  %v946_v37 = vrot.slane %v921_v34, %v1469_v8 }
 0x23f   :  { %v708_v54 = vadd.f32 %v656_v46, %v520_v42  ;;  %v710_v55 = vadd.f32 %v699_v47, %v563_v43  ;;  %v735_v2 = vadd.f32 %v721_v44, %v705_v50  ;;  %v737_v3 = vadd.f32 %v729_v45, %v707_v51 }
 0x240   :  { %v658_v56 = vpop.f32.mrf.mxu0  ;;  %v701_v57 = vpop.f32.mrf.mxu1  ;;  %v742_v19 = vmax.f32 %v734_v11, 0.0  ;;  %v744_v20 = vmax.f32 %v736_v12, 0.0 }
 0x241   :  { %v709_v58 = vadd.f32 %v658_v56, %v522_v48  ;;  %v711_v59 = vadd.f32 %v701_v57, %v565_v49  ;;  %v738_v62 = vadd.f32 %v717_v40, %v708_v54  ;;  %v740_v63 = vadd.f32 %v725_v41, %v710_v55 }
 0x242   :  { %v743_v17 = vmax.f32 %v735_v2, 0.0  ;;  %v745_v18 = vmax.f32 %v737_v3, 0.0  ;;  %v1318_v54 = vmov 1966171168  }
 0x243   :  { %v739_v4 = vadd.f32 %v721_v44, %v709_v58  ;;  %v741_v5 = vadd.f32 %v729_v45, %v711_v59  ;;  %v746_v13 = vmax.f32 %v738_v62, 0.0  ;;  %v748_v16 = vmax.f32 %v740_v63, 0.0 }
 0x244   :  { %v1061_v55 = vunpack.c.l.s4 %v1318_v54 }
 0x245   :  { %v747_v6 = vmax.f32 %v739_v4, 0.0  ;;  %v749_v9 = vmax.f32 %v741_v5, 0.0 }
 0x246   :  { %v1062_v56 = vunpack.c.0.s8 %v1061_v55 }
 0x247   :  { %802 = vmatprep.subr.mxu0 %v747_v6  ;;  %872 = vmatprep.subr.mxu1 %v749_v9 }
 0x248   :  { %803 = vmatpush1.xpose.msra.mxu0 %v746_v13  ;;  %873 = vmatpush1.xpose.msra.mxu1 %v748_v16  ;;  %v1065_v59 = vsub.s32 %v1062_v56, %v1466_v7 }
 0x249   :  { %804 = vmatprep.subr.mxu0 %v743_v17  ;;  %874 = vmatprep.subr.mxu1 %v745_v18 }
 0x24c   :  { %805 = vmatpush1.xpose.msra.mxu0 %v742_v19  ;;  %875 = vmatpush1.xpose.msra.mxu1 %v744_v20 }
 0x24d   :  { %1190 = vmatprep.subr.bf16.mxu1 %v1316_v1  ;;  %971 = vmatprep.subr.bf16.mxu0 %v1251_v23 }
 0x24f   :  { %839 = vmatmul.mubr.f32.vlgmr.msra.gmra.mxu0 %v757_v21  ;;  %909 = vmatmul.mubr.f32.vlgmr.msra.gmra.mxu1 %v765_v22 }
 0x250   :  { %989 = vmatprep.mubr.bf16.mxu0 %v1315_v0  ;;  %1192 = vmatprep.mubr.msk.bf16.mxu1 %vm1317_vm0, %v1316_v1 }
 0x251   :  { %972 = vmatpush1.bf16.msra.mxu0 %v1249_v24  ;;  %1191 = vmatpush3.bf16.msra.mxu1 %v1252_v25 }
 0x30f   :  { %v840_v26 = vpop.f32.mrf.mxu0  ;;  %v910_v27 = vpop.f32.mrf.mxu1 }
 0x310   :  { %v841_v28 = vadd.f32 %v840_v26, %v752_v10 }
 0x311   :  { %v842_v29 = vpop.f32.mrf.mxu0  ;;  %v912_v0 = vpop.f32.mrf.mxu1 }
 0x312   :  { %v911_v30 = vadd.f32 %v910_v27, %v841_v28 }
 0x314   :  { %v915_v33 = vsel %vm914_vm10, %v911_v30, 0.0 }
 0x315   :  { %v916_v1 = vpack.c.bf16 %v915_v33, %v915_v33 }
 0x317   :  { %1141 = vmatmul.mubr.msk.bf16.vlgmr.msra.gmra.mxu0 %vm186_vm6, %v916_v1  ;;  %1193 = vmatmul.mubr.msk.bf16.vlgmr.msra.gmra.mxu1 %vm186_vm6, %v916_v1 }
 0x3d7   :  { %v991_v15 = vpop.f32.mrf.mxu0  ;;  %v1032_v38 = vpop.f32.mrf.mxu1 }
 0x3d8   :  { %v992_v39 = vadd.f32 %v991_v15, %v942_v35  ;;  %v1033_v40 = vadd.f32 %v1032_v38, %v950_v36 }
 0x3d9   :  { %v993_v41 = vpop.f32.mrf.mxu0  ;;  %v1194_v42 = vpop.f32.mrf.mxu1 }
 0x3da   :  { %v1143_v43 = vmul.f32 -1.442695, %v992_v39  ;;  %v1145_v44 = vmul.f32 -1.442695, %v1033_v40  ;;  %v994_v45 = vadd.f32 %v993_v41, %v946_v37 }
 0x3db   :  { %v995_v46 = vpop.f32.mrf.mxu0  ;;  %v1035_v47 = vpop.f32.mrf.mxu1 }
 0x3dc   :  { %1253 = vpow2.f32 %v1143_v43  ;;  %v1144_v48 = vmul.f32 -1.442695, %v994_v45 }
 0x3dd   :  { %1255 = vpow2.f32 %v1145_v44  ;;  %v996_v49 = vpop.f32.mrf.mxu0  ;;  %v1195_v31 = vpop.f32.mrf.mxu1 }
 0x3de   :  { %1257 = vpow2.f32 %v1144_v48 }
 0x3e9   :  { %v1254_v32 = vpop.eup %1253 }
 0x3ea   :  { %v1256_v50 = vpop.eup %1255  ;;  %v1047_v8 = vadd.f32 1.0, %v1254_v32 }
 0x3eb   :  { %v1258_v51 = vpop.eup %1257  ;;  %v1049_v52 = vadd.f32 1.0, %v1256_v50 }
 0x3ec   :  { %1259 = vrcp.f32 %v1047_v8  ;;  %v1048_v53 = vadd.f32 1.0, %v1258_v51 }
 0x3ed   :  { %1261 = vrcp.f32 %v1049_v52 }
 0x3ee   :  { %1263 = vrcp.f32 %v1048_v53 }
 0x3f9   :  { %v1260_v57 = vpop.eup %1259 }
 0x3fa   :  { %v1262_v58 = vpop.eup %1261 }
 0x3fb   :  { %v1264_v60 = vpop.eup %1263  ;;  %v1073_v62 = vrot.slane %v1262_v58, %v1065_v59 }
 0x3fc   :  { %v1059_v61 = vcombine.low %v1260_v57, %v1264_v60 }
 0x3fe   :  { %v1066_v63 = vrot.slane %v1059_v61, %v1065_v59 }
 0x400   :  { %v1074_v2 = vcombine.low %v1066_v63, %v1073_v62 }
 0x402   :  { %v1081_v3 = vrot.slane %v1074_v2, %v1065_v59 }
 0x404   :  { %1087 = vst.msk [vmem:[%s1528_s11] sm:$0x7] %vm1085_vm11, %v1081_v3 }
 0x405   :  { %1092 = vsyncpa [#allocation4], 1 }
 0x406   :  { %1093 = vsyncpa [#allocation6], 1 }

</bundles_post_ra>
